<compile_context>
chip_gen: v6e
topology: v6e:2x2x1
jax: 0.10.0
libtpu: 0.0.40
codegen_flags: <defaults>
</compile_context>

<pallas_src>
import functools

import jax
import jax.numpy as jnp
from jax.experimental import pallas as pl
from jax.experimental.pallas import tpu as pltpu


# ----------------------------------------------------------------------------
# Prologue: projections + attention scores, computed ONCE for all nodes.
# ----------------------------------------------------------------------------
def _gat_proj_kernel(x_ref, wf_ref, a_ref, b_ref,
                     proj_ref, skip_ref, src_ref, tgt_ref, *, num_heads, hf):
    """One row tile of the one-shot projection/scoring prologue.

    x_ref    : (tp, F_in)      node features
    wf_ref   : (F_in, 2*H*F)   fused [linear_proj | skip_proj] weight
    a_ref    : (H*F, 2*H)      block-diagonal [scoring_src | scoring_tgt]
    b_ref    : (1, H*F)        bias
    proj_ref : (tp, H*F)       projected features (attention values)
    skip_ref : (tp, H*F)       skip projection + bias
    src_ref  : (tp, H)         per-head source scores
    tgt_ref  : (H, tp)         per-head target scores, lane-dense along nodes
    """
    x = x_ref[...].astype(jnp.float32)
    ps = jnp.dot(x, wf_ref[...], preferred_element_type=jnp.float32)     # (tp, 2HF)
    proj = ps[:, :hf]                                                    # (tp, HF)
    st = jnp.dot(proj, a_ref[...], preferred_element_type=jnp.float32)   # (tp, 2H)
    proj_ref[...] = proj
    skip_ref[...] = ps[:, hf:] + b_ref[...]                              # skip + bias
    src_ref[...] = st[:, :num_heads]
    tgt_ref[...] = st[:, num_heads:].T                                   # (H, tp)


# ----------------------------------------------------------------------------
# Main kernel: flash-style masked attention + aggregation + skip + bias + ELU.
# ----------------------------------------------------------------------------
def _gat_attn_kernel(mask_ref, src_ref, tgt_ref, v_ref, skip_ref, o_ref,
                     m_ref, l_ref, acc_ref, *, num_heads, f_out):
    """One (query-row tile, key-column tile) block.

    mask_ref : (tile_n, tile_k) int8  adjacency (1 edge, 0 no edge, -1 padding)
    src_ref  : (tile_n, H)      f32   source scores of the query rows
    tgt_ref  : (H, tile_k)      f32   target scores of this key block
    v_ref    : (tile_k, H*F)    f32   projected features of this key block
    skip_ref : (tile_n, H*F)    f32   skip projection + bias of the query rows
    o_ref    : (tile_n, H*F)    f32   output (written on the last key block)
    m/l/acc  : online-softmax running max / sum / weighted-value accumulators
    """
    j = pl.program_id(1)

    @pl.when(j == 0)
    def _init():
        m_ref[...] = jnp.full(m_ref.shape, -1e30, jnp.float32)
        l_ref[...] = jnp.zeros(l_ref.shape, jnp.float32)
        acc_ref[...] = jnp.zeros(acc_ref.shape, jnp.float32)

    # int8 adjacency -> additive mask: 1 -> 0, 0 -> -1e9 (the reference value),
    # -1 (padding) -> -2e9 (strictly below any real entry).  Built once per
    # block and shared across heads.
    mask_add = (mask_ref[...].astype(jnp.float32) - 1.0) * 1e9           # (tile_n, tile_k)

    for h in range(num_heads):                                           # H small: static unroll
        src = src_ref[:, h:h + 1]                                        # (tile_n, 1)
        tgt = tgt_ref[h:h + 1, :]                                        # (1, tile_k)
        lg = src + tgt                                                   # (tile_n, tile_k)
        lg = jnp.where(lg > 0, lg, 0.2 * lg)                             # LeakyReLU(0.2)
        lg = lg + mask_add                                               # masked logits

        # Online softmax with a MASKED running max (safe for zero-degree rows
        # and rows where off-edge logits dominate).
        m_prev = m_ref[:, h:h + 1]
        m_new = jnp.maximum(m_prev, jnp.max(lg, axis=-1, keepdims=True))
        alpha = jnp.exp(m_prev - m_new)                                  # rescale factor
        p = jnp.exp(lg - m_new)                                          # (tile_n, tile_k)

        l_ref[:, h:h + 1] = (alpha * l_ref[:, h:h + 1]
                             + jnp.sum(p, axis=-1, keepdims=True))
        # bf16 p @ V with f32 accumulation (bf16-native MXU on v5e/v6e/v7x).
        v_h = v_ref[:, h * f_out:(h + 1) * f_out]                        # (tile_k, F)
        acc_ref[h] = alpha * acc_ref[h] + jnp.dot(
            p.astype(jnp.bfloat16), v_h.astype(jnp.bfloat16),
            preferred_element_type=jnp.float32)
        m_ref[:, h:h + 1] = m_new

    @pl.when(j == pl.num_programs(1) - 1)
    def _finalize():
        heads = [acc_ref[h] * pl.reciprocal(l_ref[:, h:h + 1], approx=False)
                 for h in range(num_heads)]
        out = jnp.concatenate(heads, axis=-1) + skip_ref[...]            # (tile_n, H*F)
        out = jnp.where(out > 0, out, jnp.expm1(jnp.minimum(out, 0.0)))  # ELU
        o_ref[...] = out


# ----------------------------------------------------------------------------
# Wrapper
# ----------------------------------------------------------------------------
def _round_up(x, m):
    return ((x + m - 1) // m) * m


def _block_diag(a):
    """(H, F) per-head scoring vectors -> (H*F, H) block-diagonal matrix."""
    h, f = a.shape
    eye = jnp.eye(h, dtype=a.dtype)
    return (a[:, :, None] * eye[:, None, :]).reshape(h * f, h)


def gat_layer2_forward(x, connectivity_mask, params, *, num_heads, f_out,
                       tile_n=256, tile_k=512):
    n, f_in = x.shape
    hf = num_heads * f_out
    assert connectivity_mask.shape == (n, n)

    # ---- one-time parameter packing (layout plumbing, not per-row compute) ----
    w_fused = jnp.concatenate([params["w_proj"], params["w_skip"]], axis=1)   # (F_in, 2HF)
    a_bd = jnp.concatenate(
        [_block_diag(params["a_src"]), _block_diag(params["a_tgt"])], axis=1)  # (HF, 2H)
    bias = params["bias"].reshape(1, hf)

    # int8 adjacency (1 = edge, 0 = no edge).  The module's connectivity mask
    # is 0 on edges and a large negative value (-1e9 / -inf) off edges.
    adj = (connectivity_mask >= 0.0).astype(jnp.int8)

    # ---- tile sizes & padding (no single-full-tile fallback) ----
    tile_n = _round_up(min(int(tile_n), _round_up(n, 32)), 32)    # query rows per tile
    tile_k = _round_up(min(int(tile_k), _round_up(n, 128)), 128)  # key cols per tile
    n_rows = _round_up(n, tile_n)                                 # padded query rows
    n_cols = _round_up(n, tile_k)                                 # padded key columns
    n_pad = _round_up(max(n_rows, n_cols), 128)                   # prologue node count

    x_pad = jnp.pad(x, ((0, n_pad - n), (0, 0)))
    # Padding value -1 -> additive mask -2e9 (below the real off-edge -1e9),
    # so padded key columns can never enter any softmax.
    adj_pad = jnp.pad(adj, ((0, n_rows - n), (0, n_cols - n)), constant_values=-1)

    # ---- prologue: projections / scores, computed ONCE (hoisted out of grid) ----
    tp = 512 if n_pad % 512 == 0 else (256 if n_pad % 256 == 0 else 128)
    tp = min(tp, n_pad)
    proj_all, skip_all, src_all, tgt_all = pl.pallas_call(
        functools.partial(_gat_proj_kernel, num_heads=num_heads, hf=hf),
        out_shape=(
            jax.ShapeDtypeStruct((n_pad, hf), jnp.float32),           # proj (values)
            jax.ShapeDtypeStruct((n_pad, hf), jnp.float32),           # skip + bias
            jax.ShapeDtypeStruct((n_pad, num_heads), jnp.float32),    # src scores
            jax.ShapeDtypeStruct((num_heads, n_pad), jnp.float32),    # tgt scores (H, N)
        ),
        grid=(n_pad // tp,),
        in_specs=[
            pl.BlockSpec((tp, f_in), lambda i: (i, 0)),
            pl.BlockSpec((f_in, 2 * hf), lambda i: (0, 0)),
            pl.BlockSpec((hf, 2 * num_heads), lambda i: (0, 0)),
            pl.BlockSpec((1, hf), lambda i: (0, 0)),
        ],
        out_specs=(
            pl.BlockSpec((tp, hf), lambda i: (i, 0)),
            pl.BlockSpec((tp, hf), lambda i: (i, 0)),
            pl.BlockSpec((tp, num_heads), lambda i: (i, 0)),
            pl.BlockSpec((num_heads, tp), lambda i: (0, i)),
        ),
        compiler_params=pltpu.CompilerParams(
            dimension_semantics=("parallel",)),
    )(x_pad, w_fused, a_bd, bias)

    src_q = src_all[:n_rows]
    skip_q = skip_all[:n_rows]
    v_k = proj_all[:n_cols]
    tgt_k = tgt_all[:, :n_cols]

    # ---- attention: flash-style over (row tile, key-column tile) ----
    grid = (n_rows // tile_n, n_cols // tile_k)
    kernel = functools.partial(_gat_attn_kernel, num_heads=num_heads, f_out=f_out)
    out_pad = pl.pallas_call(
        kernel,
        out_shape=jax.ShapeDtypeStruct((n_rows, hf), jnp.float32),
        grid=grid,
        in_specs=[
            pl.BlockSpec((tile_n, tile_k), lambda i, j: (i, j)),      # adjacency (int8)
            pl.BlockSpec((tile_n, num_heads), lambda i, j: (i, 0)),   # src scores
            pl.BlockSpec((num_heads, tile_k), lambda i, j: (0, j)),   # tgt scores
            pl.BlockSpec((tile_k, hf), lambda i, j: (j, 0)),          # values (proj)
            pl.BlockSpec((tile_n, hf), lambda i, j: (i, 0)),          # skip + bias
        ],
        out_specs=pl.BlockSpec((tile_n, hf), lambda i, j: (i, 0)),
        scratch_shapes=[
            pltpu.VMEM((tile_n, num_heads), jnp.float32),             # running max
            pltpu.VMEM((tile_n, num_heads), jnp.float32),             # running sum
            pltpu.VMEM((num_heads, tile_n, f_out), jnp.float32),      # accumulators
        ],
        compiler_params=pltpu.CompilerParams(
            dimension_semantics=("parallel", "arbitrary"),
            vmem_limit_bytes=48 * 1024 * 1024),
    )(adj_pad, src_q, tgt_k, v_k, skip_q)

    # Module returns (out_nodes_features, connectivity_mask).
    return out_pad[:n], connectivity_mask


# ----------------------------------------------------------------------------
# Parameter init + pure-JAX reference (eval-mode semantics of the module).
# ----------------------------------------------------------------------------
def init_params(key, f_in, f_out, num_heads):
    hf = num_heads * f_out
    k1, k2, k3, k4 = jax.random.split(key, 4)

    def xavier(k, shape, fan_in, fan_out):
        bound = (6.0 / (fan_in + fan_out)) ** 0.5
        return jax.random.uniform(k, shape, jnp.float32, -bound, bound)

    return {
        # nn.Linear weight is (out, in); stored transposed (in, out) for x @ W.
        "w_proj": xavier(k1, (f_in, hf), f_in, hf),
        "w_skip": xavier(k2, (f_in, hf), f_in, hf),
        "a_src": xavier(k3, (num_heads, f_out), f_out, num_heads),
        "a_tgt": xavier(k4, (num_heads, f_out), f_out, num_heads),
        "bias": jnp.zeros((1, hf), jnp.float32),
    }


def reference_forward(x, mask, params, *, num_heads, f_out):
    n = x.shape[0]
    proj = x @ params["w_proj"]                                   # (N, H*F)
    proj3 = proj.reshape(n, num_heads, f_out)                     # (N, H, F)
    s_src = jnp.sum(proj3 * params["a_src"][None], axis=-1)       # (N, H)
    s_tgt = jnp.sum(proj3 * params["a_tgt"][None], axis=-1)       # (N, H)
    logits = s_src.T[:, :, None] + s_tgt.T[:, None, :]            # (H, N, N)
    logits = jax.nn.leaky_relu(logits, 0.2)
    attn = jax.nn.softmax(logits + mask[None], axis=-1)
    out = jnp.einsum("hij,jhf->ihf", attn, proj3)                 # (N, H, F)
    out = out + (x @ params["w_skip"]).reshape(n, num_heads, f_out)
    out = out.reshape(n, num_heads * f_out) + params["bias"]
    return jax.nn.elu(out)


if __name__ == "__main__":
    # N deliberately NOT a tile multiple -> exercises the padding path.
    N, F_IN, F_OUT, H = 200, 32, 16, 4

    key = jax.random.PRNGKey(0)
    k_x, k_adj, k_p, k_b = jax.random.split(key, 4)

    x = jax.random.normal(k_x, (N, F_IN), jnp.float32)
    adj = jax.random.bernoulli(k_adj, 0.3, (N, N))
    adj = jnp.logical_or(adj, jnp.eye(N, dtype=bool))             # self-loops
    connectivity_mask = jnp.where(adj, 0.0, -1e9).astype(jnp.float32)

    params = init_params(k_p, F_IN, F_OUT, H)
    # Exercise the bias path with a non-zero bias (the module inits it to 0).
    params["bias"] = 0.1 * jax.random.normal(k_b, (1, H * F_OUT), jnp.float32)

    ref = reference_forward(x, connectivity_mask, params, num_heads=H, f_out=F_OUT)

    # Run 1: default tiles -> clamped to a single (row, key) block for tiny N
    #        (minimizes per-grid-step overhead at small sizes).
    out1, _ = gat_layer2_forward(x, connectivity_mask, params,
                                 num_heads=H, f_out=F_OUT)
    # Run 2: small tiles -> exercises padding, the 2-D ("parallel","arbitrary")
    #        grid, and the multi-block online softmax accumulation.
    out2, _ = gat_layer2_forward(x, connectivity_mask, params,
                                 num_heads=H, f_out=F_OUT, tile_n=64, tile_k=128)
    out1, out2 = jax.block_until_ready((out1, out2))

    assert out1.shape == (N, H * F_OUT) and out2.shape == (N, H * F_OUT)
    # bf16 p@V aggregation (f32 accumulate): parity vs the f32 reference at 2e-2.
    assert jnp.allclose(out1, ref, rtol=2e-2, atol=2e-2), "run1 mismatch vs reference"
    assert jnp.allclose(out2, ref, rtol=2e-2, atol=2e-2), "run2 mismatch vs reference"

    print("KERNEL_OK")
</pallas_src>

<mosaic_0001>
module attributes {stable_mosaic.version = 11 : i64} {
  func.func @_gat_proj_kernel(%arg0: i32, %arg1: memref<256x32xf32, #tpu.memory_space<vmem>>, %arg2: memref<32x128xf32, #tpu.memory_space<vmem>>, %arg3: memref<64x8xf32, #tpu.memory_space<vmem>>, %arg4: memref<1x64xf32, #tpu.memory_space<vmem>>, %arg5: memref<256x64xf32, #tpu.memory_space<vmem>>, %arg6: memref<256x64xf32, #tpu.memory_space<vmem>>, %arg7: memref<256x4xf32, #tpu.memory_space<vmem>>, %arg8: memref<4x256xf32, #tpu.memory_space<vmem>>) attributes {dimension_semantics = [#tpu.dimension_semantics<parallel>], iteration_bounds = array<i64: 1>, scalar_prefetch = 0 : i64, scratch_operands = 0 : i64, tpu.core_type = #tpu.core_type<tc>, window_params = [{transform_indices = @transform_0, window_bounds = array<i64: 256, 32>}, {pipeline_mode = #tpu.pipeline_mode<synchronous>, transform_indices = @transform_1, window_bounds = array<i64: 32, 128>}, {pipeline_mode = #tpu.pipeline_mode<synchronous>, transform_indices = @transform_2, window_bounds = array<i64: 64, 8>}, {pipeline_mode = #tpu.pipeline_mode<synchronous>, transform_indices = @transform_3, window_bounds = array<i64: 1, 64>}, {transform_indices = @transform_4, window_bounds = array<i64: 256, 64>}, {transform_indices = @transform_5, window_bounds = array<i64: 256, 64>}, {transform_indices = @transform_6, window_bounds = array<i64: 256, 4>}, {transform_indices = @transform_7, window_bounds = array<i64: 4, 256>}]} {
    %c0 = arith.constant 0 : index
    %c0_0 = arith.constant 0 : index
    %0 = vector.load %arg1[%c0, %c0_0] : memref<256x32xf32, #tpu.memory_space<vmem>>, vector<256x32xf32>
    %c0_1 = arith.constant 0 : index
    %c0_2 = arith.constant 0 : index
    %1 = vector.load %arg2[%c0_1, %c0_2] : memref<32x128xf32, #tpu.memory_space<vmem>>, vector<32x128xf32>
    %cst = arith.constant dense<0.000000e+00> : vector<256x128xf32>
    %2 = tpu.matmul %0, %1, %cst {dimension_numbers = #tpu.dot_dimension_numbers<[1], [0], [0], [1], [0, 0, 1, 1], [], []>} : vector<256x32xf32>, vector<32x128xf32>, vector<256x128xf32> -> vector<256x128xf32>
    %3 = vector.extract_strided_slice %2 {offsets = [0, 0], sizes = [256, 64], strides = [1, 1]} : vector<256x128xf32> to vector<256x64xf32>
    %c0_3 = arith.constant 0 : index
    %c0_4 = arith.constant 0 : index
    %4 = vector.load %arg3[%c0_3, %c0_4] : memref<64x8xf32, #tpu.memory_space<vmem>>, vector<64x8xf32>
    %cst_5 = arith.constant dense<0.000000e+00> : vector<256x8xf32>
    %5 = tpu.matmul %3, %4, %cst_5 {dimension_numbers = #tpu.dot_dimension_numbers<[1], [0], [0], [1], [0, 0, 1, 1], [], []>} : vector<256x64xf32>, vector<64x8xf32>, vector<256x8xf32> -> vector<256x8xf32>
    %c0_6 = arith.constant 0 : index
    %c0_7 = arith.constant 0 : index
    %6 = vector.load %arg5[%c0_6, %c0_7] : memref<256x64xf32, #tpu.memory_space<vmem>>, vector<256x64xf32>
    tpu.vector_store %arg5[%c0_6, %c0_7], %3 {strides = array<i32>} : memref<256x64xf32, #tpu.memory_space<vmem>>, vector<256x64xf32>,
    %7 = vector.extract_strided_slice %2 {offsets = [0, 64], sizes = [256, 64], strides = [1, 1]} : vector<256x128xf32> to vector<256x64xf32>
    %c0_8 = arith.constant 0 : index
    %c0_9 = arith.constant 0 : index
    %8 = vector.load %arg4[%c0_8, %c0_9] : memref<1x64xf32, #tpu.memory_space<vmem>>, vector<1x64xf32>
    %9 = vector.broadcast %8 : vector<1x64xf32> to vector<256x64xf32>
    %10 = arith.addf %7, %9 : vector<256x64xf32>
    %c0_10 = arith.constant 0 : index
    %c0_11 = arith.constant 0 : index
    %11 = vector.load %arg6[%c0_10, %c0_11] : memref<256x64xf32, #tpu.memory_space<vmem>>, vector<256x64xf32>
    tpu.vector_store %arg6[%c0_10, %c0_11], %10 {strides = array<i32>} : memref<256x64xf32, #tpu.memory_space<vmem>>, vector<256x64xf32>,
    %12 = vector.extract_strided_slice %5 {offsets = [0, 0], sizes = [256, 4], strides = [1, 1]} : vector<256x8xf32> to vector<256x4xf32>
    %c0_12 = arith.constant 0 : index
    %c0_13 = arith.constant 0 : index
    %13 = vector.load %arg7[%c0_12, %c0_13] : memref<256x4xf32, #tpu.memory_space<vmem>>, vector<256x4xf32>
    tpu.vector_store %arg7[%c0_12, %c0_13], %12 {strides = array<i32>} : memref<256x4xf32, #tpu.memory_space<vmem>>, vector<256x4xf32>,
    %14 = vector.extract_strided_slice %5 {offsets = [0, 4], sizes = [256, 4], strides = [1, 1]} : vector<256x8xf32> to vector<256x4xf32>
    %15 = tpu.transpose %14, [1, 0] : vector<256x4xf32> -> vector<4x256xf32>
    %c0_14 = arith.constant 0 : index
    %c0_15 = arith.constant 0 : index
    %16 = vector.load %arg8[%c0_14, %c0_15] : memref<4x256xf32, #tpu.memory_space<vmem>>, vector<4x256xf32>
    tpu.vector_store %arg8[%c0_14, %c0_15], %15 {strides = array<i32>} : memref<4x256xf32, #tpu.memory_space<vmem>>, vector<4x256xf32>,
    return
  }
  func.func @transform_0(%arg0: i32) -> (i32, i32) {
    %c0_i32 = arith.constant 0 : i32
    %c0_i32_0 = arith.constant 0 : i32
    return %arg0, %c0_i32 : i32, i32
  }
  func.func @transform_1(%arg0: i32) -> (i32, i32) {
    %c0_i32 = arith.constant 0 : i32
    %c0_i32_0 = arith.constant 0 : i32
    %c0_i32_1 = arith.constant 0 : i32
    return %c0_i32, %c0_i32_0 : i32, i32
  }
  func.func @transform_2(%arg0: i32) -> (i32, i32) {
    %c0_i32 = arith.constant 0 : i32
    %c0_i32_0 = arith.constant 0 : i32
    %c0_i32_1 = arith.constant 0 : i32
    return %c0_i32, %c0_i32_0 : i32, i32
  }
  func.func @transform_3(%arg0: i32) -> (i32, i32) {
    %c0_i32 = arith.constant 0 : i32
    %c0_i32_0 = arith.constant 0 : i32
    %c0_i32_1 = arith.constant 0 : i32
    return %c0_i32, %c0_i32_0 : i32, i32
  }
  func.func @transform_4(%arg0: i32) -> (i32, i32) {
    %c0_i32 = arith.constant 0 : i32
    %c0_i32_0 = arith.constant 0 : i32
    return %arg0, %c0_i32 : i32, i32
  }
  func.func @transform_5(%arg0: i32) -> (i32, i32) {
    %c0_i32 = arith.constant 0 : i32
    %c0_i32_0 = arith.constant 0 : i32
    return %arg0, %c0_i32 : i32, i32
  }
  func.func @transform_6(%arg0: i32) -> (i32, i32) {
    %c0_i32 = arith.constant 0 : i32
    %c0_i32_0 = arith.constant 0 : i32
    return %arg0, %c0_i32 : i32, i32
  }
  func.func @transform_7(%arg0: i32) -> (i32, i32) {
    %c0_i32 = arith.constant 0 : i32
    %c0_i32_0 = arith.constant 0 : i32
    return %c0_i32, %arg0 : i32, i32
  }
}

</mosaic_0001>

<bundles_post_ra>
// kernel: tpu_custom_call.1
= control target key start
LH: loop header
LB: loop body
LE: loop exit
PB: predicated region body
PF: predicated region fallthrough
CT: control target
= control target key end

     0   :  { %vm58_vm0 = vcmask 261120   ;;  %s1501_s20 = smov 64   ;;  %s2229_s0 = inlined_call_operand.vmem [shape: f32[256,32], index: 0, kind: input, shape index: {}]   ;;  %s2230_s1 = inlined_call_operand.vmem [shape: f32[32,128], index: 1, kind: input, shape index: {}]   ;;  %s2231_s2 = inlined_call_operand.vmem [shape: f32[64,8], index: 2, kind: input, shape index: {}]   ;;  %s2232_s3 = inlined_call_operand.vmem [shape: f32[1,64], index: 3, kind: input, shape index: {}]   ;;  %s2233_s4 = inlined_call_operand.vmem [shape: f32[256,64], index: 4, kind: output, shape index: {0}]   ;;  %s2234_s5 = inlined_call_operand.vmem [shape: f32[256,64], index: 5, kind: output, shape index: {1}]   ;;  %s2235_s6 = inlined_call_operand.vmem [shape: f32[256,4], index: 6, kind: output, shape index: {2}]   ;;  %s2236_s7 = inlined_call_operand.hbm [shape: f32[4,256], index: 7, kind: output, shape index: {3}]  }
   0x1   :  { %v57_v0 = vld [vmem:[%s2230_s1 + $0x18] sm:$0xff]  ;;  %v56_v1 = vld [vmem:[%s2230_s1 + $0x10] sm:$0xff]  ;;  %v22_v2 = vld [vmem:[%s2229_s0] sm:$0xff] }
   0x2   :  { %1340 = vmatprep.subr.mxu0 %v57_v0  ;;  %v55_v3 = vld [vmem:[%s2230_s1 + $0x8] sm:$0xff]  ;;  %1348 = vmatprep.mubr.msk.f32.mxu0 %vm58_vm0, %v22_v2  ;;  %v54_v4 = vld [vmem:[%s2230_s1] sm:$0xff]  ;;  %v24_v6 = vld [vmem:[%s2229_s0 + $0x10] sm:$0xff] }
   0x3   :  { %1341 = vmatpush3.msra.mxu0 %v57_v0  ;;  %v23_v5 = vld [vmem:[%s2229_s0 + $0x8] sm:$0xff]  ;;  %v25_v7 = vld [vmem:[%s2229_s0 + $0x18] sm:$0xff]  ;;  %v1263_v8 = vld [vmem:[%s2232_s3] ss:$0 sm:$0xff] }
   0x4   :  { %1342 = vmatprep.subr.mxu0 %v56_v1  ;;  %v26_v9 = vld [vmem:[%s2229_s0 + $0x20] sm:$0xff]  ;;  %748 = vrot.lane.b32.xlu0 %v1263_v8, %s1501_s20  ;;  %v387_v10 = vld [vmem:[%s2231_s2 + $0x38] sm:$0xff]  ;;  %v386_v11 = vld [vmem:[%s2231_s2 + $0x30] sm:$0xff] }
   0x5   :  { %1343 = vmatpush3.msra.mxu0 %v56_v1  ;;  %v27_v12 = vld [vmem:[%s2229_s0 + $0x28] sm:$0xff]  ;;  %v28_v14 = vld [vmem:[%s2229_s0 + $0x30] sm:$0xff]  ;;  %1460 = vmatprep.subr.mxu1 %v387_v10 }
   0x6   :  { %1344 = vmatprep.subr.mxu0 %v55_v3  ;;  %v385_v13 = vld [vmem:[%s2231_s2 + $0x28] sm:$0xff] }
   0x7   :  { %1345 = vmatpush3.msra.mxu0 %v55_v3 }
   0x8   :  { %1346 = vmatprep.subr.mxu0 %v54_v4 }
   0x9   :  { %1347 = vmatpush3.msra.mxu0 %v54_v4 }
   0xa   :  { %1349 = vmatmul.mubr.msk.f32.vlgmr.msra.gmra.mxu0 %vm58_vm0, %v23_v5  ;;  %1396 = vmatprep.subr.mxu0 %v387_v10 }
   0xb   :  { %1351 = vmatprep.mubr.msk.f32.mxu0 %vm58_vm0, %v24_v6  ;;  %1397 = vmatpush3.msra.mxu0 %v387_v10 }
   0xc   :  { %1398 = vmatprep.subr.mxu0 %v386_v11 }
   0xe   :  { %1352 = vmatmul.mubr.msk.f32.gmra.mxu0 %vm58_vm0, %v25_v7 }
   0xf   :  { %1354 = vmatprep.mubr.msk.f32.mxu0 %vm58_vm0, %v26_v9 }
  0x10   :  { %13 = vsyncpa [#allocation3], 0  ;;  %1399 = vmatpush3.msra.mxu0 %v386_v11  ;;  %v384_v15 = vld [vmem:[%s2231_s2 + $0x20] sm:$0xff]  ;;  %1468 = vmatpush3.msra.mxu1 %v387_v10  ;;  %v29_v16 = vld [vmem:[%s2229_s0 + $0x38] sm:$0xff]  ;;  %vm388_vm1 = vcmask 523264   ;;  %vm943_vm2 = vcmask 31744  }
  0x11   :  { %1400 = vmatprep.subr.mxu0 %v385_v13  ;;  %v383_v17 = vld [vmem:[%s2231_s2 + $0x18] sm:$0xff]  ;;  %v30_v18 = vld [vmem:[%s2229_s0 + $0x40] sm:$0xff]  ;;  %1461 = vmatprep.subr.mxu1 %v386_v11  ;;  %v382_v19 = vld [vmem:[%s2231_s2 + $0x10] sm:$0xff]  ;;  %s1502_s11 = smov 124  }
  0x12   :  { %1355 = vmatmul.mubr.msk.f32.gmra.mxu0 %vm58_vm0, %v27_v12  ;;  %1469 = vmatpush3.msra.mxu1 %v386_v11  ;;  %v31_v20 = vld [vmem:[%s2229_s0 + $0x48] sm:$0xff]  ;;  %v32_v22 = vld [vmem:[%s2229_s0 + $0x50] sm:$0xff]  ;;  %v380_v23 = vld [vmem:[%s2231_s2] sm:$0xff] }
  0x13   :  { %1357 = vmatprep.mubr.msk.f32.mxu0 %vm58_vm0, %v28_v14  ;;  %1401 = vmatpush3.msra.mxu0 %v385_v13  ;;  %v381_v21 = vld [vmem:[%s2231_s2 + $0x8] sm:$0xff]  ;;  %v33_v24 = vld [vmem:[%s2229_s0 + $0x58] sm:$0xff]  ;;  %v34_v25 = vld [vmem:[%s2229_s0 + $0x60] sm:$0xff] }
  0x14   :  { %1402 = vmatprep.subr.mxu0 %v384_v15  ;;  %1462 = vmatprep.subr.mxu1 %v385_v13  ;;  %v35_v26 = vld [vmem:[%s2229_s0 + $0x68] sm:$0xff]  ;;  %v36_v27 = vld [vmem:[%s2229_s0 + $0x70] sm:$0xff]  ;;  %v37_v28 = vld [vmem:[%s2229_s0 + $0x78] sm:$0xff] }
  0x15   :  { %1403 = vmatpush3.msra.mxu0 %v384_v15  ;;  %1470 = vmatpush3.msra.mxu1 %v385_v13  ;;  %v38_v29 = vld [vmem:[%s2229_s0 + $0x80] sm:$0xff]  ;;  %v39_v30 = vld [vmem:[%s2229_s0 + $0x88] sm:$0xff]  ;;  %v40_v31 = vld [vmem:[%s2229_s0 + $0x90] sm:$0xff] }
  0x16   :  { %1358 = vmatmul.mubr.msk.f32.gmra.mxu0 %vm58_vm0, %v29_v16  ;;  %1404 = vmatprep.subr.mxu0 %v383_v17  ;;  %v41_v32 = vld [vmem:[%s2229_s0 + $0x98] sm:$0xff]  ;;  %v42_v33 = vld [vmem:[%s2229_s0 + $0xa0] sm:$0xff]  ;;  %v43_v34 = vld [vmem:[%s2229_s0 + $0xa8] sm:$0xff] }
  0x17   :  { %1360 = vmatprep.mubr.msk.f32.mxu0 %vm58_vm0, %v30_v18  ;;  %1405 = vmatpush3.msra.mxu0 %v383_v17  ;;  %v44_v35 = vld [vmem:[%s2229_s0 + $0xb0] sm:$0xff]  ;;  %v45_v36 = vld [vmem:[%s2229_s0 + $0xb8] sm:$0xff]  ;;  %v46_v37 = vld [vmem:[%s2229_s0 + $0xc0] sm:$0xff] }
  0x18   :  { %1406 = vmatprep.subr.mxu0 %v382_v19  ;;  %1463 = vmatprep.subr.mxu1 %v384_v15  ;;  %v47_v38 = vld [vmem:[%s2229_s0 + $0xc8] sm:$0xff]  ;;  %v48_v39 = vld [vmem:[%s2229_s0 + $0xd0] sm:$0xff]  ;;  %v49_v40 = vld [vmem:[%s2229_s0 + $0xd8] sm:$0xff] }
  0x19   :  { %1407 = vmatpush3.msra.mxu0 %v382_v19  ;;  %1471 = vmatpush3.msra.mxu1 %v384_v15  ;;  %v50_v41 = vld [vmem:[%s2229_s0 + $0xe0] sm:$0xff]  ;;  %v51_v42 = vld [vmem:[%s2229_s0 + $0xe8] sm:$0xff]  ;;  %v52_v43 = vld [vmem:[%s2229_s0 + $0xf0] sm:$0xff] }
  0x1a   :  { %1361 = vmatmul.mubr.msk.f32.gmra.mxu0 %vm58_vm0, %v31_v20  ;;  %1408 = vmatprep.subr.mxu0 %v381_v21  ;;  %v53_v44 = vld [vmem:[%s2229_s0 + $0xf8] sm:$0xff] }
  0x1b   :  { %1363 = vmatprep.mubr.msk.f32.mxu0 %vm58_vm0, %v32_v22  ;;  %1409 = vmatpush3.msra.mxu0 %v381_v21 }
  0x1c   :  { %1410 = vmatprep.subr.mxu0 %v380_v23  ;;  %1464 = vmatprep.subr.mxu1 %v383_v17 }
  0x1d   :  { %1411 = vmatpush3.msra.mxu0 %v380_v23  ;;  %1472 = vmatpush3.msra.mxu1 %v383_v17 }
  0x1e   :  { %1364 = vmatmul.mubr.msk.f32.gmra.mxu0 %vm58_vm0, %v33_v24  ;;  %1465 = vmatprep.subr.mxu1 %v382_v19 }
  0x1f   :  { %1366 = vmatprep.mubr.msk.f32.mxu0 %vm58_vm0, %v34_v25  ;;  %1473 = vmatpush3.msra.mxu1 %v382_v19 }
  0x20   :  { %1466 = vmatprep.subr.mxu1 %v381_v21 }
  0x21   :  { %1474 = vmatpush3.msra.mxu1 %v381_v21 }
  0x22   :  { %1367 = vmatmul.mubr.msk.f32.gmra.mxu0 %vm58_vm0, %v35_v26  ;;  %1467 = vmatprep.subr.mxu1 %v380_v23 }
  0x23   :  { %1369 = vmatprep.mubr.msk.f32.mxu0 %vm58_vm0, %v36_v27  ;;  %1475 = vmatpush3.msra.mxu1 %v380_v23 }
  0x26   :  { %1370 = vmatmul.mubr.msk.f32.gmra.mxu0 %vm58_vm0, %v37_v28 }
  0x27   :  { %1372 = vmatprep.mubr.msk.f32.mxu0 %vm58_vm0, %v38_v29 }
  0x2a   :  { %1373 = vmatmul.mubr.msk.f32.gmra.mxu0 %vm58_vm0, %v39_v30 }
  0x2b   :  { %1375 = vmatprep.mubr.msk.f32.mxu0 %vm58_vm0, %v40_v31 }
  0x2e   :  { %1376 = vmatmul.mubr.msk.f32.gmra.mxu0 %vm58_vm0, %v41_v32 }
  0x2f   :  { %1378 = vmatprep.mubr.msk.f32.mxu0 %vm58_vm0, %v42_v33 }
  0x32   :  { %1379 = vmatmul.mubr.msk.f32.gmra.mxu0 %vm58_vm0, %v43_v34 }
  0x33   :  { %1381 = vmatprep.mubr.msk.f32.mxu0 %vm58_vm0, %v44_v35 }
  0x36   :  { %1382 = vmatmul.mubr.msk.f32.gmra.mxu0 %vm58_vm0, %v45_v36 }
  0x37   :  { %1384 = vmatprep.mubr.msk.f32.mxu0 %vm58_vm0, %v46_v37 }
  0x3a   :  { %1385 = vmatmul.mubr.msk.f32.gmra.mxu0 %vm58_vm0, %v47_v38 }
  0x3b   :  { %1387 = vmatprep.mubr.msk.f32.mxu0 %vm58_vm0, %v48_v39 }
  0x3e   :  { %1388 = vmatmul.mubr.msk.f32.gmra.mxu0 %vm58_vm0, %v49_v40 }
  0x3f   :  { %1390 = vmatprep.mubr.msk.f32.mxu0 %vm58_vm0, %v50_v41 }
  0x42   :  { %1391 = vmatmul.mubr.msk.f32.gmra.mxu0 %vm58_vm0, %v51_v42 }
  0x43   :  { %1393 = vmatprep.mubr.msk.f32.mxu0 %vm58_vm0, %v52_v43 }
  0x46   :  { %1394 = vmatmul.mubr.msk.f32.gmra.mxu0 %vm58_vm0, %v53_v44 }
  0x76   :  { %v1712_v45 = vpop.permute.xlu0 %748 }
  0xca   :  { %v1350_v46 = vpop.f32.mrf.mxu0 }
  0xcb   :  { %711 = vst.msk [vmem:[%s2233_s4 + $0x8] sm:$0xff] %vm388_vm1, %v1350_v46  ;;  %v752_v47 = vadd.f32 %v1350_v46, %v1712_v45 }
  0xcc   :  { %v221_v48 = vpop.f32.mrf.mxu0 }
  0xcd   :  { %710 = vst.msk [vmem:[%s2233_s4] sm:$0xff] %vm388_vm1, %v221_v48  ;;  %v751_v49 = vadd.f32 %v1712_v45, %v221_v48  ;;  %817 = vrot.lane.b32.xlu1 %v752_v47, %s1501_s20  ;;  %1412 = vmatprep.mubr.msk.f32.mxu0 %vm388_vm1, %v221_v48 }
  0xce   :  { %v1353_v50 = vpop.f32.mrf.mxu0  ;;  %1413 = vmatmul.mubr.msk.f32.vlgmr.msra.gmra.mxu0 %vm388_vm1, %v1350_v46 }
  0xcf   :  { %713 = vst.msk [vmem:[%s2233_s4 + $0x18] sm:$0xff] %vm388_vm1, %v1353_v50  ;;  %815 = vrot.lane.b32.xlu0 %v751_v49, %s1501_s20  ;;  %v754_v52 = vadd.f32 %v1353_v50, %v1712_v45 }
  0xd0   :  { %v231_v51 = vpop.f32.mrf.mxu0 }
  0xd1   :  { %712 = vst.msk [vmem:[%s2233_s4 + $0x10] sm:$0xff] %vm388_vm1, %v231_v51  ;;  %v753_v53 = vadd.f32 %v1712_v45, %v231_v51  ;;  %1415 = vmatprep.mubr.msk.f32.mxu1 %vm388_vm1, %v231_v51 }
  0xd2   :  { %v1356_v54 = vpop.f32.mrf.mxu0  ;;  %1416 = vmatmul.mubr.msk.f32.vlgmr.msra.gmra.mxu1 %vm388_vm1, %v1353_v50 }
  0xd3   :  { %715 = vst.msk [vmem:[%s2233_s4 + $0x28] sm:$0xff] %vm388_vm1, %v1356_v54  ;;  %821 = vrot.lane.b32.xlu0 %v754_v52, %s1501_s20  ;;  %819 = vrot.lane.b32.xlu1 %v753_v53, %s1501_s20  ;;  %v756_v56 = vadd.f32 %v1356_v54, %v1712_v45 }
  0xd4   :  { %v241_v55 = vpop.f32.mrf.mxu0 }
  0xd5   :  { %714 = vst.msk [vmem:[%s2233_s4 + $0x20] sm:$0xff] %vm388_vm1, %v241_v55  ;;  %v755_v57 = vadd.f32 %v1712_v45, %v241_v55  ;;  %1418 = vmatprep.mubr.msk.f32.mxu1 %vm388_vm1, %v241_v55 }
  0xd6   :  { %v1359_v58 = vpop.f32.mrf.mxu0  ;;  %1419 = vmatmul.mubr.msk.f32.gmra.mxu1 %vm388_vm1, %v1356_v54 }
  0xd7   :  { %717 = vst.msk [vmem:[%s2233_s4 + $0x38] sm:$0xff] %vm388_vm1, %v1359_v58  ;;  %825 = vrot.lane.b32.xlu0 %v756_v56, %s1501_s20  ;;  %823 = vrot.lane.b32.xlu1 %v755_v57, %s1501_s20  ;;  %v758_v60 = vadd.f32 %v1359_v58, %v1712_v45 }
  0xd8   :  { %v251_v59 = vpop.f32.mrf.mxu0 }
  0xd9   :  { %716 = vst.msk [vmem:[%s2233_s4 + $0x30] sm:$0xff] %vm388_vm1, %v251_v59  ;;  %v757_v61 = vadd.f32 %v1712_v45, %v251_v59  ;;  %1421 = vmatprep.mubr.msk.f32.mxu1 %vm388_vm1, %v251_v59 }
  0xda   :  { %v1362_v62 = vpop.f32.mrf.mxu0  ;;  %1422 = vmatmul.mubr.msk.f32.gmra.mxu1 %vm388_vm1, %v1359_v58 }
  0xdb   :  { %719 = vst.msk [vmem:[%s2233_s4 + $0x48] sm:$0xff] %vm388_vm1, %v1362_v62  ;;  %v760_v63 = vadd.f32 %v1362_v62, %v1712_v45  ;;  %829 = vrot.lane.b32.xlu0 %v758_v60, %s1501_s20  ;;  %827 = vrot.lane.b32.xlu1 %v757_v61, %s1501_s20 }
  0xdc   :  { %v261_v0 = vpop.f32.mrf.mxu0 }
  0xdd   :  { %718 = vst.msk [vmem:[%s2233_s4 + $0x40] sm:$0xff] %vm388_vm1, %v261_v0  ;;  %v759_v1 = vadd.f32 %v1712_v45, %v261_v0  ;;  %1424 = vmatprep.mubr.msk.f32.mxu1 %vm388_vm1, %v261_v0 }
  0xde   :  { %1425 = vmatmul.mubr.msk.f32.gmra.mxu1 %vm388_vm1, %v1362_v62  ;;  %v1365_v2 = vpop.f32.mrf.mxu0 }
  0xdf   :  { %833 = vrot.lane.b32.xlu0 %v760_v63, %s1501_s20  ;;  %831 = vrot.lane.b32.xlu1 %v759_v1, %s1501_s20  ;;  %721 = vst.msk [vmem:[%s2233_s4 + $0x58] sm:$0xff] %vm388_vm1, %v1365_v2  ;;  %v762_v3 = vadd.f32 %v1365_v2, %v1712_v45 }
  0xe0   :  { %v271_v4 = vpop.f32.mrf.mxu0 }
  0xe1   :  { %720 = vst.msk [vmem:[%s2233_s4 + $0x50] sm:$0xff] %vm388_vm1, %v271_v4  ;;  %v761_v5 = vadd.f32 %v1712_v45, %v271_v4  ;;  %1427 = vmatprep.mubr.msk.f32.mxu1 %vm388_vm1, %v271_v4 }
  0xe2   :  { %1428 = vmatmul.mubr.msk.f32.gmra.mxu1 %vm388_vm1, %v1365_v2  ;;  %v1368_v6 = vpop.f32.mrf.mxu0 }
  0xe3   :  { %837 = vrot.lane.b32.xlu0 %v762_v3, %s1501_s20  ;;  %835 = vrot.lane.b32.xlu1 %v761_v5, %s1501_s20  ;;  %723 = vst.msk [vmem:[%s2233_s4 + $0x68] sm:$0xff] %vm388_vm1, %v1368_v6  ;;  %v764_v7 = vadd.f32 %v1368_v6, %v1712_v45 }
  0xe4   :  { %v281_v8 = vpop.f32.mrf.mxu0 }
  0xe5   :  { %722 = vst.msk [vmem:[%s2233_s4 + $0x60] sm:$0xff] %vm388_vm1, %v281_v8  ;;  %v763_v9 = vadd.f32 %v1712_v45, %v281_v8  ;;  %1430 = vmatprep.mubr.msk.f32.mxu1 %vm388_vm1, %v281_v8 }
  0xe6   :  { %1431 = vmatmul.mubr.msk.f32.gmra.mxu1 %vm388_vm1, %v1368_v6  ;;  %v1371_v10 = vpop.f32.mrf.mxu0 }
  0xe7   :  { %725 = vst.msk [vmem:[%s2233_s4 + $0x78] sm:$0xff] %vm388_vm1, %v1371_v10  ;;  %v766_v11 = vadd.f32 %v1371_v10, %v1712_v45  ;;  %841 = vrot.lane.b32.xlu0 %v764_v7, %s1501_s20  ;;  %839 = vrot.lane.b32.xlu1 %v763_v9, %s1501_s20 }
  0xe8   :  { %v291_v12 = vpop.f32.mrf.mxu0 }
  0xe9   :  { %724 = vst.msk [vmem:[%s2233_s4 + $0x70] sm:$0xff] %vm388_vm1, %v291_v12  ;;  %v765_v13 = vadd.f32 %v1712_v45, %v291_v12  ;;  %1433 = vmatprep.mubr.msk.f32.mxu1 %vm388_vm1, %v291_v12 }
  0xea   :  { %v1374_v14 = vpop.f32.mrf.mxu0  ;;  %1434 = vmatmul.mubr.msk.f32.gmra.mxu1 %vm388_vm1, %v1371_v10 }
  0xeb   :  { %727 = vst.msk [vmem:[%s2233_s4 + $0x88] sm:$0xff] %vm388_vm1, %v1374_v14  ;;  %v768_v15 = vadd.f32 %v1374_v14, %v1712_v45  ;;  %845 = vrot.lane.b32.xlu0 %v766_v11, %s1501_s20  ;;  %843 = vrot.lane.b32.xlu1 %v765_v13, %s1501_s20 }
  0xec   :  { %v301_v16 = vpop.f32.mrf.mxu0 }
  0xed   :  { %726 = vst.msk [vmem:[%s2233_s4 + $0x80] sm:$0xff] %vm388_vm1, %v301_v16  ;;  %v767_v17 = vadd.f32 %v1712_v45, %v301_v16  ;;  %1436 = vmatprep.mubr.msk.f32.mxu1 %vm388_vm1, %v301_v16 }
  0xee   :  { %1437 = vmatmul.mubr.msk.f32.gmra.mxu1 %vm388_vm1, %v1374_v14  ;;  %v1377_v18 = vpop.f32.mrf.mxu0 }
  0xef   :  { %849 = vrot.lane.b32.xlu0 %v768_v15, %s1501_s20  ;;  %847 = vrot.lane.b32.xlu1 %v767_v17, %s1501_s20  ;;  %729 = vst.msk [vmem:[%s2233_s4 + $0x98] sm:$0xff] %vm388_vm1, %v1377_v18  ;;  %v770_v19 = vadd.f32 %v1377_v18, %v1712_v45 }
  0xf0   :  { %v311_v20 = vpop.f32.mrf.mxu0 }
  0xf1   :  { %728 = vst.msk [vmem:[%s2233_s4 + $0x90] sm:$0xff] %vm388_vm1, %v311_v20  ;;  %v769_v21 = vadd.f32 %v1712_v45, %v311_v20  ;;  %1439 = vmatprep.mubr.msk.f32.mxu1 %vm388_vm1, %v311_v20 }
  0xf2   :  { %1440 = vmatmul.mubr.msk.f32.gmra.mxu1 %vm388_vm1, %v1377_v18  ;;  %v1380_v22 = vpop.f32.mrf.mxu0 }
  0xf3   :  { %853 = vrot.lane.b32.xlu0 %v770_v19, %s1501_s20  ;;  %851 = vrot.lane.b32.xlu1 %v769_v21, %s1501_s20  ;;  %731 = vst.msk [vmem:[%s2233_s4 + $0xa8] sm:$0xff] %vm388_vm1, %v1380_v22  ;;  %v772_v23 = vadd.f32 %v1380_v22, %v1712_v45 }
  0xf4   :  { %v321_v24 = vpop.f32.mrf.mxu0 }
  0xf5   :  { %730 = vst.msk [vmem:[%s2233_s4 + $0xa0] sm:$0xff] %vm388_vm1, %v321_v24  ;;  %v771_v25 = vadd.f32 %v1712_v45, %v321_v24  ;;  %1442 = vmatprep.mubr.msk.f32.mxu1 %vm388_vm1, %v321_v24 }
  0xf6   :  { %1443 = vmatmul.mubr.msk.f32.gmra.mxu1 %vm388_vm1, %v1380_v22  ;;  %v1383_v26 = vpop.f32.mrf.mxu0 }
  0xf7   :  { %733 = vst.msk [vmem:[%s2233_s4 + $0xb8] sm:$0xff] %vm388_vm1, %v1383_v26  ;;  %v774_v27 = vadd.f32 %v1383_v26, %v1712_v45  ;;  %857 = vrot.lane.b32.xlu0 %v772_v23, %s1501_s20  ;;  %855 = vrot.lane.b32.xlu1 %v771_v25, %s1501_s20 }
  0xf8   :  { %v331_v28 = vpop.f32.mrf.mxu0 }
  0xf9   :  { %732 = vst.msk [vmem:[%s2233_s4 + $0xb0] sm:$0xff] %vm388_vm1, %v331_v28  ;;  %v773_v29 = vadd.f32 %v1712_v45, %v331_v28  ;;  %1445 = vmatprep.mubr.msk.f32.mxu1 %vm388_vm1, %v331_v28 }
  0xfa   :  { %1446 = vmatmul.mubr.msk.f32.gmra.mxu1 %vm388_vm1, %v1383_v26  ;;  %v1386_v30 = vpop.f32.mrf.mxu0 }
  0xfb   :  { %735 = vst.msk [vmem:[%s2233_s4 + $0xc8] sm:$0xff] %vm388_vm1, %v1386_v30  ;;  %v776_v31 = vadd.f32 %v1386_v30, %v1712_v45  ;;  %861 = vrot.lane.b32.xlu0 %v774_v27, %s1501_s20  ;;  %859 = vrot.lane.b32.xlu1 %v773_v29, %s1501_s20 }
  0xfc   :  { %v341_v32 = vpop.f32.mrf.mxu0 }
  0xfd   :  { %734 = vst.msk [vmem:[%s2233_s4 + $0xc0] sm:$0xff] %vm388_vm1, %v341_v32  ;;  %v775_v33 = vadd.f32 %v1712_v45, %v341_v32  ;;  %1448 = vmatprep.mubr.msk.f32.mxu1 %vm388_vm1, %v341_v32 }
  0xfe   :  { %1449 = vmatmul.mubr.msk.f32.gmra.mxu1 %vm388_vm1, %v1386_v30  ;;  %v1389_v34 = vpop.f32.mrf.mxu0 }
  0xff   :  { %737 = vst.msk [vmem:[%s2233_s4 + $0xd8] sm:$0xff] %vm388_vm1, %v1389_v34  ;;  %v778_v35 = vadd.f32 %v1389_v34, %v1712_v45  ;;  %865 = vrot.lane.b32.xlu0 %v776_v31, %s1501_s20  ;;  %863 = vrot.lane.b32.xlu1 %v775_v33, %s1501_s20 }
 0x100   :  { %v351_v36 = vpop.f32.mrf.mxu0 }
 0x101   :  { %736 = vst.msk [vmem:[%s2233_s4 + $0xd0] sm:$0xff] %vm388_vm1, %v351_v36  ;;  %v777_v37 = vadd.f32 %v1712_v45, %v351_v36  ;;  %1451 = vmatprep.mubr.msk.f32.mxu1 %vm388_vm1, %v351_v36 }
 0x102   :  { %1452 = vmatmul.mubr.msk.f32.gmra.mxu1 %vm388_vm1, %v1389_v34  ;;  %v1392_v38 = vpop.f32.mrf.mxu0 }
 0x103   :  { %739 = vst.msk [vmem:[%s2233_s4 + $0xe8] sm:$0xff] %vm388_vm1, %v1392_v38  ;;  %v780_v39 = vadd.f32 %v1392_v38, %v1712_v45  ;;  %869 = vrot.lane.b32.xlu0 %v778_v35, %s1501_s20  ;;  %867 = vrot.lane.b32.xlu1 %v777_v37, %s1501_s20 }
 0x104   :  { %v361_v40 = vpop.f32.mrf.mxu0 }
 0x105   :  { %738 = vst.msk [vmem:[%s2233_s4 + $0xe0] sm:$0xff] %vm388_vm1, %v361_v40  ;;  %v779_v41 = vadd.f32 %v1712_v45, %v361_v40  ;;  %1454 = vmatprep.mubr.msk.f32.mxu1 %vm388_vm1, %v361_v40 }
 0x106   :  { %1455 = vmatmul.mubr.msk.f32.gmra.mxu1 %vm388_vm1, %v1392_v38  ;;  %v1395_v42 = vpop.f32.mrf.mxu0 }
 0x107   :  { %741 = vst.msk [vmem:[%s2233_s4 + $0xf8] sm:$0xff] %vm388_vm1, %v1395_v42  ;;  %v782_v43 = vadd.f32 %v1395_v42, %v1712_v45  ;;  %873 = vrot.lane.b32.xlu0 %v780_v39, %s1501_s20  ;;  %871 = vrot.lane.b32.xlu1 %v779_v41, %s1501_s20 }
 0x108   :  { %v371_v44 = vpop.f32.mrf.mxu0 }
 0x109   :  { %740 = vst.msk [vmem:[%s2233_s4 + $0xf0] sm:$0xff] %vm388_vm1, %v371_v44  ;;  %v781_v46 = vadd.f32 %v1712_v45, %v371_v44  ;;  %1457 = vmatprep.mubr.msk.f32.mxu1 %vm388_vm1, %v371_v44 }
 0x10a   :  { %1458 = vmatmul.mubr.msk.f32.gmra.mxu1 %vm388_vm1, %v1395_v42 }
 0x10b   :  { %877 = vrot.lane.b32.xlu0 %v782_v43, %s1501_s20  ;;  %875 = vrot.lane.b32.xlu1 %v781_v46, %s1501_s20 }
 0x13f   :  { %v818_v47 = vpop.permute.xlu1 %817 }
 0x140   :  { %912 = vst.msk [vmem:[%s2234_s5 + $0x8] sm:$0xff] %vm388_vm1, %v818_v47 }
 0x141   :  { %v816_v48 = vpop.permute.xlu0 %815 }
 0x142   :  { %911 = vst.msk [vmem:[%s2234_s5] sm:$0xff] %vm388_vm1, %v816_v48 }
 0x145   :  { %v822_v45 = vpop.permute.xlu0 %821  ;;  %v820_v49 = vpop.permute.xlu1 %819 }
 0x146   :  { %914 = vst.msk [vmem:[%s2234_s5 + $0x18] sm:$0xff] %vm388_vm1, %v822_v45  ;;  %913 = vst.msk [vmem:[%s2234_s5 + $0x10] sm:$0xff] %vm388_vm1, %v820_v49 }
 0x149   :  { %v826_v50 = vpop.permute.xlu0 %825  ;;  %v824_v51 = vpop.permute.xlu1 %823 }
 0x14a   :  { %916 = vst.msk [vmem:[%s2234_s5 + $0x28] sm:$0xff] %vm388_vm1, %v826_v50  ;;  %915 = vst.msk [vmem:[%s2234_s5 + $0x20] sm:$0xff] %vm388_vm1, %v824_v51 }
 0x14d   :  { %v830_v52 = vpop.permute.xlu0 %829  ;;  %v828_v53 = vpop.permute.xlu1 %827 }
 0x14e   :  { %918 = vst.msk [vmem:[%s2234_s5 + $0x38] sm:$0xff] %vm388_vm1, %v830_v52  ;;  %917 = vst.msk [vmem:[%s2234_s5 + $0x30] sm:$0xff] %vm388_vm1, %v828_v53 }
 0x151   :  { %v834_v54 = vpop.permute.xlu0 %833  ;;  %v832_v55 = vpop.permute.xlu1 %831 }
 0x152   :  { %920 = vst.msk [vmem:[%s2234_s5 + $0x48] sm:$0xff] %vm388_vm1, %v834_v54  ;;  %919 = vst.msk [vmem:[%s2234_s5 + $0x40] sm:$0xff] %vm388_vm1, %v832_v55 }
 0x155   :  { %v838_v56 = vpop.permute.xlu0 %837  ;;  %v836_v57 = vpop.permute.xlu1 %835 }
 0x156   :  { %922 = vst.msk [vmem:[%s2234_s5 + $0x58] sm:$0xff] %vm388_vm1, %v838_v56  ;;  %921 = vst.msk [vmem:[%s2234_s5 + $0x50] sm:$0xff] %vm388_vm1, %v836_v57 }
 0x159   :  { %v842_v58 = vpop.permute.xlu0 %841  ;;  %v840_v59 = vpop.permute.xlu1 %839 }
 0x15a   :  { %924 = vst.msk [vmem:[%s2234_s5 + $0x68] sm:$0xff] %vm388_vm1, %v842_v58  ;;  %923 = vst.msk [vmem:[%s2234_s5 + $0x60] sm:$0xff] %vm388_vm1, %v840_v59 }
 0x15d   :  { %v846_v60 = vpop.permute.xlu0 %845  ;;  %v844_v61 = vpop.permute.xlu1 %843 }
 0x15e   :  { %926 = vst.msk [vmem:[%s2234_s5 + $0x78] sm:$0xff] %vm388_vm1, %v846_v60  ;;  %925 = vst.msk [vmem:[%s2234_s5 + $0x70] sm:$0xff] %vm388_vm1, %v844_v61 }
 0x161   :  { %v850_v62 = vpop.permute.xlu0 %849  ;;  %v848_v63 = vpop.permute.xlu1 %847 }
 0x162   :  { %928 = vst.msk [vmem:[%s2234_s5 + $0x88] sm:$0xff] %vm388_vm1, %v850_v62  ;;  %927 = vst.msk [vmem:[%s2234_s5 + $0x80] sm:$0xff] %vm388_vm1, %v848_v63 }
 0x165   :  { %v854_v0 = vpop.permute.xlu0 %853  ;;  %v852_v1 = vpop.permute.xlu1 %851 }
 0x166   :  { %930 = vst.msk [vmem:[%s2234_s5 + $0x98] sm:$0xff] %vm388_vm1, %v854_v0  ;;  %929 = vst.msk [vmem:[%s2234_s5 + $0x90] sm:$0xff] %vm388_vm1, %v852_v1 }
 0x169   :  { %v858_v2 = vpop.permute.xlu0 %857  ;;  %v856_v3 = vpop.permute.xlu1 %855 }
 0x16a   :  { %932 = vst.msk [vmem:[%s2234_s5 + $0xa8] sm:$0xff] %vm388_vm1, %v858_v2  ;;  %931 = vst.msk [vmem:[%s2234_s5 + $0xa0] sm:$0xff] %vm388_vm1, %v856_v3 }
 0x16d   :  { %v862_v4 = vpop.permute.xlu0 %861  ;;  %v860_v5 = vpop.permute.xlu1 %859 }
 0x16e   :  { %934 = vst.msk [vmem:[%s2234_s5 + $0xb8] sm:$0xff] %vm388_vm1, %v862_v4  ;;  %933 = vst.msk [vmem:[%s2234_s5 + $0xb0] sm:$0xff] %vm388_vm1, %v860_v5 }
 0x171   :  { %v866_v6 = vpop.permute.xlu0 %865  ;;  %v864_v7 = vpop.permute.xlu1 %863 }
 0x172   :  { %936 = vst.msk [vmem:[%s2234_s5 + $0xc8] sm:$0xff] %vm388_vm1, %v866_v6  ;;  %935 = vst.msk [vmem:[%s2234_s5 + $0xc0] sm:$0xff] %vm388_vm1, %v864_v7 }
 0x175   :  { %v870_v8 = vpop.permute.xlu0 %869  ;;  %v868_v9 = vpop.permute.xlu1 %867 }
 0x176   :  { %938 = vst.msk [vmem:[%s2234_s5 + $0xd8] sm:$0xff] %vm388_vm1, %v870_v8  ;;  %937 = vst.msk [vmem:[%s2234_s5 + $0xd0] sm:$0xff] %vm388_vm1, %v868_v9 }
 0x179   :  { %v874_v10 = vpop.permute.xlu0 %873  ;;  %v872_v11 = vpop.permute.xlu1 %871 }
 0x17a   :  { %940 = vst.msk [vmem:[%s2234_s5 + $0xe8] sm:$0xff] %vm388_vm1, %v874_v10  ;;  %939 = vst.msk [vmem:[%s2234_s5 + $0xe0] sm:$0xff] %vm388_vm1, %v872_v11 }
 0x17d   :  { %v878_v12 = vpop.permute.xlu0 %877  ;;  %v876_v13 = vpop.permute.xlu1 %875 }
 0x17e   :  { %942 = vst.msk [vmem:[%s2234_s5 + $0xf8] sm:$0xff] %vm388_vm1, %v878_v12  ;;  %941 = vst.msk [vmem:[%s2234_s5 + $0xf0] sm:$0xff] %vm388_vm1, %v876_v13 }
 0x18e   :  { %v1414_v14 = vpop.f32.mrf.mxu0 }
 0x18f   :  { %945 = vst.msk [vmem:[%s2235_s6 + $0x8] sm:$0xff] %vm943_vm2, %v1414_v14  ;;  %1010 = vrot.lane.b32.xlu0 %v1414_v14, %s1502_s11 }
 0x190   :  { %v551_v15 = vpop.f32.mrf.mxu0 }
 0x191   :  { %944 = vst.msk [vmem:[%s2235_s6] sm:$0xff] %vm943_vm2, %v551_v15  ;;  %1008 = vrot.lane.b32.xlu1 %v551_v15, %s1502_s11 }
 0x192   :  { %v1417_v16 = vpop.f32.mrf.mxu1 }
 0x193   :  { %947 = vst.msk [vmem:[%s2235_s6 + $0x18] sm:$0xff] %vm943_vm2, %v1417_v16  ;;  %1014 = vrot.lane.b32.xlu0 %v1417_v16, %s1502_s11 }
 0x194   :  { %v561_v17 = vpop.f32.mrf.mxu1 }
 0x195   :  { %946 = vst.msk [vmem:[%s2235_s6 + $0x10] sm:$0xff] %vm943_vm2, %v561_v17  ;;  %1012 = vrot.lane.b32.xlu1 %v561_v17, %s1502_s11 }
 0x196   :  { %v1420_v18 = vpop.f32.mrf.mxu1 }
 0x197   :  { %949 = vst.msk [vmem:[%s2235_s6 + $0x28] sm:$0xff] %vm943_vm2, %v1420_v18  ;;  %1018 = vrot.lane.b32.xlu0 %v1420_v18, %s1502_s11 }
 0x198   :  { %v571_v19 = vpop.f32.mrf.mxu1 }
 0x199   :  { %948 = vst.msk [vmem:[%s2235_s6 + $0x20] sm:$0xff] %vm943_vm2, %v571_v19  ;;  %1016 = vrot.lane.b32.xlu1 %v571_v19, %s1502_s11 }
 0x19a   :  { %v1423_v20 = vpop.f32.mrf.mxu1 }
 0x19b   :  { %951 = vst.msk [vmem:[%s2235_s6 + $0x38] sm:$0xff] %vm943_vm2, %v1423_v20  ;;  %1022 = vrot.lane.b32.xlu0 %v1423_v20, %s1502_s11 }
 0x19c   :  { %v581_v21 = vpop.f32.mrf.mxu1 }
 0x19d   :  { %950 = vst.msk [vmem:[%s2235_s6 + $0x30] sm:$0xff] %vm943_vm2, %v581_v21  ;;  %1020 = vrot.lane.b32.xlu1 %v581_v21, %s1502_s11 }
 0x19e   :  { %v1426_v22 = vpop.f32.mrf.mxu1 }
 0x19f   :  { %953 = vst.msk [vmem:[%s2235_s6 + $0x48] sm:$0xff] %vm943_vm2, %v1426_v22 }
 0x1a0   :  { %v591_v23 = vpop.f32.mrf.mxu1 }
 0x1a1   :  { %952 = vst.msk [vmem:[%s2235_s6 + $0x40] sm:$0xff] %vm943_vm2, %v591_v23  ;;  %1026 = vrot.lane.b32.xlu1 %v1426_v22, %s1502_s11 }
 0x1a2   :  { %v1429_v24 = vpop.f32.mrf.mxu1 }
 0x1a3   :  { %955 = vst.msk [vmem:[%s2235_s6 + $0x58] sm:$0xff] %vm943_vm2, %v1429_v24 }
 0x1a4   :  { %v601_v25 = vpop.f32.mrf.mxu1 }
 0x1a5   :  { %954 = vst.msk [vmem:[%s2235_s6 + $0x50] sm:$0xff] %vm943_vm2, %v601_v25  ;;  %1024 = vrot.lane.b32.xlu1 %v591_v23, %s1502_s11 }
 0x1a6   :  { %v1432_v26 = vpop.f32.mrf.mxu1 }
 0x1a7   :  { %957 = vst.msk [vmem:[%s2235_s6 + $0x68] sm:$0xff] %vm943_vm2, %v1432_v26 }
 0x1a8   :  { %v611_v27 = vpop.f32.mrf.mxu1 }
 0x1a9   :  { %1030 = vrot.lane.b32.xlu1 %v1429_v24, %s1502_s11  ;;  %956 = vst.msk [vmem:[%s2235_s6 + $0x60] sm:$0xff] %vm943_vm2, %v611_v27 }
 0x1aa   :  { %v1435_v28 = vpop.f32.mrf.mxu1 }
 0x1ab   :  { %959 = vst.msk [vmem:[%s2235_s6 + $0x78] sm:$0xff] %vm943_vm2, %v1435_v28 }
 0x1ac   :  { %v621_v29 = vpop.f32.mrf.mxu1 }
 0x1ad   :  { %1028 = vrot.lane.b32.xlu1 %v601_v25, %s1502_s11  ;;  %958 = vst.msk [vmem:[%s2235_s6 + $0x70] sm:$0xff] %vm943_vm2, %v621_v29 }
 0x1ae   :  { %v1438_v30 = vpop.f32.mrf.mxu1 }
 0x1af   :  { %961 = vst.msk [vmem:[%s2235_s6 + $0x88] sm:$0xff] %vm943_vm2, %v1438_v30 }
 0x1b0   :  { %v631_v31 = vpop.f32.mrf.mxu1 }
 0x1b1   :  { %1034 = vrot.lane.b32.xlu1 %v1432_v26, %s1502_s11  ;;  %960 = vst.msk [vmem:[%s2235_s6 + $0x80] sm:$0xff] %vm943_vm2, %v631_v31  ;;  %1040 = vrot.lane.b32.xlu0 %v631_v31, %s1502_s11 }
 0x1b2   :  { %v1441_v32 = vpop.f32.mrf.mxu1 }
 0x1b3   :  { %963 = vst.msk [vmem:[%s2235_s6 + $0x98] sm:$0xff] %vm943_vm2, %v1441_v32 }
 0x1b4   :  { %v641_v33 = vpop.f32.mrf.mxu1 }
 0x1b5   :  { %1032 = vrot.lane.b32.xlu1 %v611_v27, %s1502_s11  ;;  %962 = vst.msk [vmem:[%s2235_s6 + $0x90] sm:$0xff] %vm943_vm2, %v641_v33  ;;  %1044 = vrot.lane.b32.xlu0 %v641_v33, %s1502_s11 }
 0x1b6   :  { %v1444_v34 = vpop.f32.mrf.mxu1 }
 0x1b7   :  { %965 = vst.msk [vmem:[%s2235_s6 + $0xa8] sm:$0xff] %vm943_vm2, %v1444_v34 }
 0x1b8   :  { %v651_v35 = vpop.f32.mrf.mxu1 }
 0x1b9   :  { %1038 = vrot.lane.b32.xlu1 %v1435_v28, %s1502_s11  ;;  %964 = vst.msk [vmem:[%s2235_s6 + $0xa0] sm:$0xff] %vm943_vm2, %v651_v35  ;;  %1048 = vrot.lane.b32.xlu0 %v651_v35, %s1502_s11 }
 0x1ba   :  { %v1447_v36 = vpop.f32.mrf.mxu1 }
 0x1bb   :  { %967 = vst.msk [vmem:[%s2235_s6 + $0xb8] sm:$0xff] %vm943_vm2, %v1447_v36 }
 0x1bc   :  { %v661_v37 = vpop.f32.mrf.mxu1 }
 0x1bd   :  { %1036 = vrot.lane.b32.xlu1 %v621_v29, %s1502_s11  ;;  %966 = vst.msk [vmem:[%s2235_s6 + $0xb0] sm:$0xff] %vm943_vm2, %v661_v37  ;;  %1052 = vrot.lane.b32.xlu0 %v661_v37, %s1502_s11 }
 0x1be   :  { %v1450_v38 = vpop.f32.mrf.mxu1 }
 0x1bf   :  { %969 = vst.msk [vmem:[%s2235_s6 + $0xc8] sm:$0xff] %vm943_vm2, %v1450_v38 }
 0x1c0   :  { %v671_v39 = vpop.f32.mrf.mxu1 }
 0x1c1   :  { %1042 = vrot.lane.b32.xlu1 %v1438_v30, %s1502_s11  ;;  %1058 = vrot.lane.b32.xlu0 %v1450_v38, %s1502_s11  ;;  %968 = vst.msk [vmem:[%s2235_s6 + $0xc0] sm:$0xff] %vm943_vm2, %v671_v39 }
 0x1c2   :  { %v1453_v40 = vpop.f32.mrf.mxu1 }
 0x1c3   :  { %971 = vst.msk [vmem:[%s2235_s6 + $0xd8] sm:$0xff] %vm943_vm2, %v1453_v40 }
 0x1c4   :  { %v681_v41 = vpop.f32.mrf.mxu1 }
 0x1c5   :  { %1046 = vrot.lane.b32.xlu1 %v1441_v32, %s1502_s11  ;;  %1056 = vrot.lane.b32.xlu0 %v671_v39, %s1502_s11  ;;  %970 = vst.msk [vmem:[%s2235_s6 + $0xd0] sm:$0xff] %vm943_vm2, %v681_v41 }
 0x1c6   :  { %v1456_v42 = vpop.f32.mrf.mxu1 }
 0x1c7   :  { %973 = vst.msk [vmem:[%s2235_s6 + $0xe8] sm:$0xff] %vm943_vm2, %v1456_v42 }
 0x1c8   :  { %v691_v43 = vpop.f32.mrf.mxu1 }
 0x1c9   :  { %1050 = vrot.lane.b32.xlu1 %v1444_v34, %s1502_s11  ;;  %1062 = vrot.lane.b32.xlu0 %v1453_v40, %s1502_s11  ;;  %972 = vst.msk [vmem:[%s2235_s6 + $0xe0] sm:$0xff] %vm943_vm2, %v691_v43 }
 0x1ca   :  { %v1459_v44 = vpop.f32.mrf.mxu1 }
 0x1cb   :  { %975 = vst.msk [vmem:[%s2235_s6 + $0xf8] sm:$0xff] %vm943_vm2, %v1459_v44 }
 0x1cc   :  { %v701_v46 = vpop.f32.mrf.mxu1 }
 0x1cd   :  { %1054 = vrot.lane.b32.xlu1 %v1447_v36, %s1502_s11  ;;  %1060 = vrot.lane.b32.xlu0 %v681_v41, %s1502_s11  ;;  %974 = vst.msk [vmem:[%s2235_s6 + $0xf0] sm:$0xff] %vm943_vm2, %v701_v46  ;;  %s1503_s6 = smov [#allocation2]  }
 0x1d1   :  { %1066 = vrot.lane.b32.xlu0 %v1456_v42, %s1502_s11 }
 0x1d5   :  { %1064 = vrot.lane.b32.xlu0 %v691_v43, %s1502_s11 }
 0x1d9   :  { %1070 = vrot.lane.b32.xlu0 %v1459_v44, %s1502_s11 }
 0x1dd   :  { %1068 = vrot.lane.b32.xlu0 %v701_v46, %s1502_s11  ;;  %s1185_s11 = sshll.u32 %s1503_s6, 4  ;;  %s1186_s11 = int_to_ptr.vmem [resolvable:$true] %s1185_s11 }
 0x1de   :  { %s1479_s1 = scalar_lea.vmem %s1186_s11, 128  ;;  %p1484_p1 = scmp.lt.s32.totalorder %s1186_s11, %s1186_s11 }
 0x1df   :  { %p1480_p0 = scmp.ne.s32.totalorder %s1186_s11, %s1479_s1  ;;  %p1485_p2 = scmp.lt.s32.totalorder %s1479_s1, %s1479_s1 }
 0x1e1   :  { %p1486_p3 = por %p1485_p2, %p1484_p1 }
 0x1e3   :  { %p1487_p4 = pnand %p1486_p3, %p1480_p0 }
 0x201   :  { %v1011_v48 = vpop.permute.xlu0 %1010 }
 0x203   :  { %v1009_v47 = vpop.permute.xlu1 %1008 }
 0x204   :  { %1104 = vxpose.xlu1.b32.start [1/16] (narrow) %v1009_v47, 8 }
 0x205   :  { %v1015_v50 = vpop.permute.xlu0 %1014 }
 0x207   :  { %v1013_v45 = vpop.permute.xlu1 %1012 }
 0x208   :  { %1105 = vxpose.xlu1.b32.cont [2/16] (narrow) %v1011_v48, 8 }
 0x209   :  { %v1019_v53 = vpop.permute.xlu0 %1018 }
 0x20b   :  { %v1017_v49 = vpop.permute.xlu1 %1016 }
 0x20c   :  { %1106 = vxpose.xlu1.b32.cont [3/16] (narrow) %v1013_v45, 8 }
 0x20d   :  { %v1023_v56 = vpop.permute.xlu0 %1022 }
 0x20f   :  { %v1021_v51 = vpop.permute.xlu1 %1020 }
 0x210   :  { %1107 = vxpose.xlu1.b32.cont [4/16] (narrow) %v1015_v50, 8 }
 0x213   :  { %v1027_v52 = vpop.permute.xlu1 %1026 }
 0x214   :  { %1108 = vxpose.xlu1.b32.cont [5/16] (narrow) %v1017_v49, 8 }
 0x217   :  { %v1025_v54 = vpop.permute.xlu1 %1024 }
 0x218   :  { %1109 = vxpose.xlu1.b32.cont [6/16] (narrow) %v1019_v53, 8 }
 0x21b   :  { %v1031_v55 = vpop.permute.xlu1 %1030 }
 0x21c   :  { %1110 = vxpose.xlu1.b32.cont [7/16] (narrow) %v1021_v51, 8 }
 0x21f   :  { %v1029_v57 = vpop.permute.xlu1 %1028 }
 0x220   :  { %1111 = vxpose.xlu1.b32.cont [8/16] (narrow) %v1023_v56, 8 }
 0x223   :  { %v1035_v58 = vpop.permute.xlu1 %1034  ;;  %v1041_v59 = vpop.permute.xlu0 %1040 }
 0x224   :  { %1112 = vxpose.xlu1.b32.cont [9/16] (narrow) %v1025_v54, 8  ;;  %1136 = vxpose.xlu0.b32.start [1/16] (narrow) %v1041_v59, 8 }
 0x227   :  { %v1033_v60 = vpop.permute.xlu1 %1032  ;;  %v1045_v63 = vpop.permute.xlu0 %1044 }
 0x228   :  { %1113 = vxpose.xlu1.b32.cont [10/16] (narrow) %v1027_v52, 8 }
 0x22b   :  { %v1039_v61 = vpop.permute.xlu1 %1038  ;;  %v1049_v1 = vpop.permute.xlu0 %1048 }
 0x22c   :  { %1114 = vxpose.xlu1.b32.cont [11/16] (narrow) %v1029_v57, 8 }
 0x22f   :  { %v1037_v62 = vpop.permute.xlu1 %1036  ;;  %v1053_v2 = vpop.permute.xlu0 %1052 }
 0x230   :  { %1115 = vxpose.xlu1.b32.cont [12/16] (narrow) %v1031_v55, 8 }
 0x233   :  { %v1043_v0 = vpop.permute.xlu1 %1042  ;;  %v1059_v4 = vpop.permute.xlu0 %1058 }
 0x234   :  { %1116 = vxpose.xlu1.b32.cont [13/16] (narrow) %v1033_v60, 8  ;;  %1137 = vxpose.xlu0.b32.cont [2/16] (narrow) %v1043_v0, 8 }
 0x237   :  { %v1047_v3 = vpop.permute.xlu1 %1046  ;;  %v1057_v6 = vpop.permute.xlu0 %1056 }
 0x238   :  { %1117 = vxpose.xlu1.b32.cont [14/16] (narrow) %v1035_v58, 8  ;;  %1138 = vxpose.xlu0.b32.cont [3/16] (narrow) %v1045_v63, 8 }
 0x23b   :  { %v1051_v5 = vpop.permute.xlu1 %1050  ;;  %v1063_v7 = vpop.permute.xlu0 %1062 }
 0x23c   :  { %1118 = vxpose.xlu1.b32.cont [15/16] (narrow) %v1037_v62, 8  ;;  %1139 = vxpose.xlu0.b32.cont [4/16] (narrow) %v1047_v3, 8 }
 0x23f   :  { %v1055_v8 = vpop.permute.xlu1 %1054  ;;  %v1061_v9 = vpop.permute.xlu0 %1060 }
 0x240   :  { %1119 = vxpose.xlu1.b32.end [16/16] (narrow) %v1039_v61, 8  ;;  %1140 = vxpose.xlu0.b32.cont [5/16] (narrow) %v1049_v1, 8 }
 0x243   :  { %v1067_v10 = vpop.permute.xlu0 %1066 }
 0x244   :  { %1141 = vxpose.xlu0.b32.cont [6/16] (narrow) %v1051_v5, 8 }
 0x247   :  { %v1065_v11 = vpop.permute.xlu0 %1064 }
 0x248   :  { %1142 = vxpose.xlu0.b32.cont [7/16] (narrow) %v1053_v2, 8 }
 0x24b   :  { %v1071_v12 = vpop.permute.xlu0 %1070 }
 0x24c   :  { %1143 = vxpose.xlu0.b32.cont [8/16] (narrow) %v1055_v8, 8 }
 0x24f   :  { %v1069_v13 = vpop.permute.xlu0 %1068 }
 0x250   :  { %1144 = vxpose.xlu0.b32.cont [9/16] (narrow) %v1057_v6, 8 }
 0x254   :  { %1145 = vxpose.xlu0.b32.cont [10/16] (narrow) %v1059_v4, 8 }
 0x258   :  { %1146 = vxpose.xlu0.b32.cont [11/16] (narrow) %v1061_v9, 8 }
 0x25c   :  { %1147 = vxpose.xlu0.b32.cont [12/16] (narrow) %v1063_v7, 8 }
 0x260   :  { %1148 = vxpose.xlu0.b32.cont [13/16] (narrow) %v1065_v11, 8 }
 0x264   :  { %1149 = vxpose.xlu0.b32.cont [14/16] (narrow) %v1067_v10, 8 }
 0x268   :  { %1150 = vxpose.xlu0.b32.cont [15/16] (narrow) %v1069_v13, 8 }
 0x26c   :  { %1151 = vxpose.xlu0.b32.end [16/16] (narrow) %v1071_v12, 8 }
 0x280   :  { %v1120_v14 = vpop.trf.xlu1 }
 0x2ac   :  { %v1152_v15 = vpop.trf.xlu0 }
 0x2ad   :  { %v1170_v16 = vcombine.low %v1120_v14, %v1152_v15 }
 0x2af   :  { %1172 = vst [vmem:[#allocation2] sm:$0xff] %v1170_v16 }
 0x2b0   :  { %1490 = shalt.err (!%p1487_p4)
}
 0x2b1   :  { %1188 = dma.vmem_to_hbm [thread:$0]  %s1186_s11, 128, %s2236_s7, [#allocation3]  }
 0x2b2   :  { %1499 = dma.done.wait [#allocation3], 128  }
 0x2b3   :  { %1500 = vsyncadd [#allocation3], 4294967168 }
 0x2b4   :  { %1198 = vsyncpa [#allocation3], 1 }

</bundles_post_ra>
